<compile_context>
chip_gen: v5e
topology: v5e:2x2
jax: 0.10.0
libtpu: 0.0.40
codegen_flags: <defaults>
</compile_context>

<pallas_src>
import jax
import jax.numpy as jnp
from jax.experimental import pallas as pl
from jax.experimental.pallas import tpu as pltpu

F_IN = 60  # feature width of the Deep MLP


def deep_mlp_kernel(x_ref, w1_ref, b1_ref, w2_ref, w3_ref, wo_ref, o_ref):
    # x_ref : (T, 60)  f32   block of x in its natural (batch, features) layout
    # w1_ref: (61, 60) bf16  [[W1], [0...0]]
    # b1_ref: (61, 1)  f32   [b1; 1.0]  (last entry creates the constant ones row)
    # w2_ref: (61, 61) bf16  [[W2, b2], [0...0, 1]]
    # w3_ref: (61, 61) bf16  [[W3, b3], [0...0, 1]]
    # wo_ref: (1, 61)  bf16  [wo, bo]
    # o_ref : (1, T)   f32   lane-dense output row
    x = x_ref[...].astype(jnp.bfloat16)                              # (T, 60)

    # Layer 1: W1_aug @ x^T with the transpose fused into the MXU matmul
    # (contraction on the last dim of both operands, like q @ k.T).
    z1 = jax.lax.dot_general(
        w1_ref[...], x, (((1,), (1,)), ((), ())),
        preferred_element_type=jnp.float32)                          # (61, T)
    # b1_aug's last entry (1.0) creates the ones row used by the folded biases
    # of the following layers; ReLU keeps it at 1.
    h = jnp.maximum(z1 + b1_ref[...], 0.0).astype(jnp.bfloat16)      # (61, T)

    def layer(h_bf16, w_ref):
        # Bias is folded into the last column of the augmented weight; the
        # [0,...,0,1] row propagates the ones row, so the epilogue is just
        # ReLU + bf16 cast.
        z = jnp.dot(w_ref[...], h_bf16, preferred_element_type=jnp.float32)
        return jnp.maximum(z, 0.0).astype(jnp.bfloat16)

    h = layer(h, w2_ref)                                             # (61, T)
    h = layer(h, w3_ref)                                             # (61, T)

    # Output layer on the MXU: (1, 61) @ (61, T); bias already folded.
    z = jnp.dot(wo_ref[...], h, preferred_element_type=jnp.float32)  # (1, T)

    # Exact sigmoid (runs only on the (1, T) tail -> negligible cost).
    o_ref[...] = 1.0 / (1.0 + jnp.exp(-z))


def _round_up(x, m):
    return (x + m - 1) // m * m


def _choose_tile_b(B):
    # Small B: a single right-sized tile (no wasted padded work).
    # Larger B: big tiles (<= 8192) to amortize the ~0.35 us/step overhead
    # while guaranteeing >= 2 grid steps so both v7x TensorCores get work.
    if B <= 1024:
        return _round_up(max(B, 8), 8)
    return min(8192, _round_up(pl.cdiv(B, 2), 128))


def deep_forward(x, params, *, tile_b=None, x_buffers=None):
    """x: (B, 60) f32; params in PyTorch layout. Returns (B, 1) f32.

    tile_b:   batch rows per grid step. Default is chosen from B (<=8192,
              >=2 steps for large B). VMEM use is a few MB even at 8192.
    x_buffers: optional pipeline depth for the x input (e.g. 3 on v5e if the
              profile shows exposed input DMA after enlarging tile_b).
    """
    B, F = x.shape
    assert F == F_IN, f"expected {F_IN} input features, got {F}"

    if tile_b is None:
        tile_b = _choose_tile_b(B)
    tile_b = _round_up(int(tile_b), 8)
    n_tiles = pl.cdiv(B, tile_b)
    if n_tiles > 1 and tile_b % 128 != 0:
        # Multi-tile output blocks must be lane-aligned (last dim % 128 == 0).
        tile_b = _round_up(tile_b, 128)
        n_tiles = pl.cdiv(B, tile_b)
    b_pad = n_tiles * tile_b
    if b_pad != B:
        x = jnp.pad(x, ((0, b_pad - B), (0, 0)))

    bf16 = jnp.bfloat16
    f32 = jnp.float32

    # Build augmented weights once (tiny, done in XLA); cast to bf16 once so
    # the kernel never re-casts resident weights per grid step.
    w1a = jnp.concatenate(
        [params["w1"], jnp.zeros((1, F), f32)], axis=0).astype(bf16)       # (61, 60)
    b1a = jnp.concatenate(
        [params["b1"].astype(f32), jnp.ones((1,), f32)]).reshape(F + 1, 1)  # (61, 1)

    def square_aug(w, b):
        top = jnp.concatenate([w, b.reshape(F, 1)], axis=1)                # (60, 61)
        bot = jnp.zeros((1, F + 1), f32).at[0, F].set(1.0)                 # (1, 61)
        return jnp.concatenate([top, bot], axis=0).astype(bf16)            # (61, 61)

    w2a = square_aug(params["w2"], params["b2"])
    w3a = square_aug(params["w3"], params["b3"])
    woa = jnp.concatenate(
        [params["wo"], params["bo"].reshape(1, 1)], axis=1).astype(bf16)   # (1, 61)

    def resident(shape):
        # Constant index_map -> stays in VMEM, DMA'd once, never re-fetched.
        return pl.BlockSpec(shape, lambda i: (0, 0))

    if x_buffers is not None and x_buffers != 2:
        x_spec = pl.BlockSpec((tile_b, F), lambda i: (i, 0),
                              pipeline_mode=pl.Buffered(int(x_buffers)))
    else:
        x_spec = pl.BlockSpec((tile_b, F), lambda i: (i, 0))

    out = pl.pallas_call(
        deep_mlp_kernel,
        out_shape=jax.ShapeDtypeStruct((1, b_pad), jnp.float32),
        grid=(n_tiles,),
        in_specs=[
            x_spec,                       # x tile (pipelined)
            resident((F + 1, F)),         # w1_aug
            resident((F + 1, 1)),         # b1_aug
            resident((F + 1, F + 1)),     # w2_aug
            resident((F + 1, F + 1)),     # w3_aug
            resident((1, F + 1)),         # wo_aug
        ],
        out_specs=pl.BlockSpec((1, tile_b), lambda i: (0, i)),
        compiler_params=pltpu.CompilerParams(
            dimension_semantics=("parallel",)),   # megacore sharding on v7x
    )(x, w1a, b1a, w2a, w3a, woa)

    return out[0, :B].reshape(B, 1)


def init_params(key):
    """Deterministic init mirroring nn.Linear's U(-1/sqrt(fan_in), 1/sqrt(fan_in)).

    PyTorch layout: w (out_features, in_features), b (out_features,).
    """
    def linear(k, fan_in, fan_out):
        kw, kb = jax.random.split(k)
        bound = 1.0 / jnp.sqrt(jnp.float32(fan_in))
        w = jax.random.uniform(kw, (fan_out, fan_in), jnp.float32, -bound, bound)
        b = jax.random.uniform(kb, (fan_out,), jnp.float32, -bound, bound)
        return w, b

    k1, k2, k3, k4 = jax.random.split(key, 4)
    w1, b1 = linear(k1, 60, 60)
    w2, b2 = linear(k2, 60, 60)
    w3, b3 = linear(k3, 60, 60)
    wo, bo = linear(k4, 60, 1)
    return dict(w1=w1, b1=b1, w2=w2, b2=b2, w3=w3, b3=b3, wo=wo, bo=bo)


def reference_forward_f32(x, p):
    """Pure-f32 reference matching the PyTorch module exactly."""
    h = jnp.maximum(x @ p["w1"].T + p["b1"], 0.0)
    h = jnp.maximum(h @ p["w2"].T + p["b2"], 0.0)
    h = jnp.maximum(h @ p["w3"].T + p["b3"], 0.0)
    z = h @ p["wo"].T + p["bo"]
    return 1.0 / (1.0 + jnp.exp(-z))


def reference_forward_bf16(x, p):
    """Reference with the same bf16-operand / f32-accumulate / folded-bias
    recipe as the kernel."""
    bf = lambda a: a.astype(jnp.bfloat16)

    def dotT(a_bf16, w_bf16):  # a (B, K) . w (M, K)^T -> (B, M) f32
        return jax.lax.dot_general(a_bf16, w_bf16, (((1,), (1,)), ((), ())),
                                   preferred_element_type=jnp.float32)

    ones = jnp.ones((x.shape[0], 1), jnp.bfloat16)
    w2a = bf(jnp.concatenate([p["w2"], p["b2"].reshape(-1, 1)], axis=1))
    w3a = bf(jnp.concatenate([p["w3"], p["b3"].reshape(-1, 1)], axis=1))
    woa = bf(jnp.concatenate([p["wo"], p["bo"].reshape(1, 1)], axis=1))

    h = bf(x)
    h = bf(jnp.maximum(dotT(h, bf(p["w1"])) + p["b1"], 0.0))
    h = bf(jnp.maximum(dotT(jnp.concatenate([h, ones], axis=1), w2a), 0.0))
    h = bf(jnp.maximum(dotT(jnp.concatenate([h, ones], axis=1), w3a), 0.0))
    z = dotT(jnp.concatenate([h, ones], axis=1), woa)
    return 1.0 / (1.0 + jnp.exp(-z))


if __name__ == "__main__":
    key = jax.random.PRNGKey(0)
    kx, kp = jax.random.split(key)
    params = init_params(kp)

    # Small shapes: exercise single-tile, padded single-tile, and 2-tile paths.
    for B in (16, 200, 1040):
        x = jax.random.normal(jax.random.fold_in(kx, B), (B, 60), jnp.float32)
        out = jax.block_until_ready(deep_forward(x, params))
        assert out.shape == (B, 1), out.shape

        ref16 = reference_forward_bf16(x, params)   # same precision recipe as kernel
        ref32 = reference_forward_f32(x, params)    # original module semantics
        assert jnp.allclose(out, ref16, atol=2e-3, rtol=2e-3), \
            f"mismatch vs bf16-matched reference at B={B}"
        assert jnp.allclose(out, ref32, atol=3e-2, rtol=0.0), \
            f"mismatch vs f32 reference at B={B}"

    print("KERNEL_OK")
</pallas_src>

<mosaic_0001>
module attributes {stable_mosaic.version = 11 : i64} {
  func.func @deep_mlp_kernel(%arg0: i32, %arg1: memref<16x60xf32, #tpu.memory_space<vmem>>, %arg2: memref<61x60xbf16, #tpu.memory_space<vmem>>, %arg3: memref<61x1xf32, #tpu.memory_space<vmem>>, %arg4: memref<61x61xbf16, #tpu.memory_space<vmem>>, %arg5: memref<61x61xbf16, #tpu.memory_space<vmem>>, %arg6: memref<1x61xbf16, #tpu.memory_space<vmem>>, %arg7: memref<1x16xf32, #tpu.memory_space<vmem>>) attributes {dimension_semantics = [#tpu.dimension_semantics<parallel>], iteration_bounds = array<i64: 1>, scalar_prefetch = 0 : i64, scratch_operands = 0 : i64, tpu.core_type = #tpu.core_type<tc>, window_params = [{transform_indices = @transform_0, window_bounds = array<i64: 16, 60>}, {pipeline_mode = #tpu.pipeline_mode<synchronous>, transform_indices = @transform_1, window_bounds = array<i64: 61, 60>}, {pipeline_mode = #tpu.pipeline_mode<synchronous>, transform_indices = @transform_2, window_bounds = array<i64: 61, 1>}, {pipeline_mode = #tpu.pipeline_mode<synchronous>, transform_indices = @transform_3, window_bounds = array<i64: 61, 61>}, {pipeline_mode = #tpu.pipeline_mode<synchronous>, transform_indices = @transform_4, window_bounds = array<i64: 61, 61>}, {pipeline_mode = #tpu.pipeline_mode<synchronous>, transform_indices = @transform_5, window_bounds = array<i64: 1, 61>}, {transform_indices = @transform_6, window_bounds = array<i64: 1, 16>}]} {
    %c0 = arith.constant 0 : index
    %c0_0 = arith.constant 0 : index
    %0 = vector.load %arg1[%c0, %c0_0] : memref<16x60xf32, #tpu.memory_space<vmem>>, vector<16x60xf32>
    %1 = arith.truncf %0 : vector<16x60xf32> to vector<16x60xbf16>
    %c0_1 = arith.constant 0 : index
    %c0_2 = arith.constant 0 : index
    %2 = vector.load %arg2[%c0_1, %c0_2] : memref<61x60xbf16, #tpu.memory_space<vmem>>, vector<61x60xbf16>
    %cst = arith.constant dense<0.000000e+00> : vector<61x16xf32>
    %3 = tpu.matmul %2, %1, %cst {dimension_numbers = #tpu.dot_dimension_numbers<[1], [1], [0], [0], [0, 0, 1, 0], [], []>} : vector<61x60xbf16>, vector<16x60xbf16>, vector<61x16xf32> -> vector<61x16xf32>
    %c0_3 = arith.constant 0 : index
    %c0_4 = arith.constant 0 : index
    %4 = vector.load %arg3[%c0_3, %c0_4] : memref<61x1xf32, #tpu.memory_space<vmem>>, vector<61x1xf32>
    %5 = vector.broadcast %4 : vector<61x1xf32> to vector<61x16xf32>
    %6 = arith.addf %3, %5 : vector<61x16xf32>
    %cst_5 = arith.constant 0.000000e+00 : f32
    %7 = vector.broadcast %cst_5 : f32 to vector<61x16xf32>
    %8 = arith.maximumf %6, %7 : vector<61x16xf32>
    %9 = arith.truncf %8 : vector<61x16xf32> to vector<61x16xbf16>
    %c0_6 = arith.constant 0 : index
    %c0_7 = arith.constant 0 : index
    %10 = vector.load %arg4[%c0_6, %c0_7] : memref<61x61xbf16, #tpu.memory_space<vmem>>, vector<61x61xbf16>
    %cst_8 = arith.constant dense<0.000000e+00> : vector<61x16xf32>
    %11 = tpu.matmul %10, %9, %cst_8 {dimension_numbers = #tpu.dot_dimension_numbers<[1], [0], [0], [1], [0, 0, 1, 1], [], []>} : vector<61x61xbf16>, vector<61x16xbf16>, vector<61x16xf32> -> vector<61x16xf32>
    %cst_9 = arith.constant 0.000000e+00 : f32
    %12 = vector.broadcast %cst_9 : f32 to vector<61x16xf32>
    %13 = arith.maximumf %11, %12 : vector<61x16xf32>
    %14 = arith.truncf %13 : vector<61x16xf32> to vector<61x16xbf16>
    %c0_10 = arith.constant 0 : index
    %c0_11 = arith.constant 0 : index
    %15 = vector.load %arg5[%c0_10, %c0_11] : memref<61x61xbf16, #tpu.memory_space<vmem>>, vector<61x61xbf16>
    %cst_12 = arith.constant dense<0.000000e+00> : vector<61x16xf32>
    %16 = tpu.matmul %15, %14, %cst_12 {dimension_numbers = #tpu.dot_dimension_numbers<[1], [0], [0], [1], [0, 0, 1, 1], [], []>} : vector<61x61xbf16>, vector<61x16xbf16>, vector<61x16xf32> -> vector<61x16xf32>
    %cst_13 = arith.constant 0.000000e+00 : f32
    %17 = vector.broadcast %cst_13 : f32 to vector<61x16xf32>
    %18 = arith.maximumf %16, %17 : vector<61x16xf32>
    %19 = arith.truncf %18 : vector<61x16xf32> to vector<61x16xbf16>
    %c0_14 = arith.constant 0 : index
    %c0_15 = arith.constant 0 : index
    %20 = vector.load %arg6[%c0_14, %c0_15] : memref<1x61xbf16, #tpu.memory_space<vmem>>, vector<1x61xbf16>
    %cst_16 = arith.constant dense<0.000000e+00> : vector<1x16xf32>
    %21 = tpu.matmul %20, %19, %cst_16 {dimension_numbers = #tpu.dot_dimension_numbers<[1], [0], [0], [1], [0, 0, 1, 1], [], []>} : vector<1x61xbf16>, vector<61x16xbf16>, vector<1x16xf32> -> vector<1x16xf32>
    %cst_17 = arith.constant 0.000000e+00 : f32
    %22 = vector.broadcast %cst_17 : f32 to vector<1x16xf32>
    %23 = arith.subf %22, %21 : vector<1x16xf32>
    %24 = math.exp %23 : vector<1x16xf32>
    %cst_18 = arith.constant 1.000000e+00 : f32
    %25 = vector.broadcast %cst_18 : f32 to vector<1x16xf32>
    %26 = arith.addf %25, %24 : vector<1x16xf32>
    %cst_19 = arith.constant 1.000000e+00 : f32
    %27 = vector.broadcast %cst_19 : f32 to vector<1x16xf32>
    %28 = arith.divf %27, %26 : vector<1x16xf32>
    %c0_20 = arith.constant 0 : index
    %c0_21 = arith.constant 0 : index
    %29 = vector.load %arg7[%c0_20, %c0_21] : memref<1x16xf32, #tpu.memory_space<vmem>>, vector<1x16xf32>
    tpu.vector_store %arg7[%c0_20, %c0_21], %28 {strides = array<i32>} : memref<1x16xf32, #tpu.memory_space<vmem>>, vector<1x16xf32>,
    return
  }
  func.func @transform_0(%arg0: i32) -> (i32, i32) {
    %c0_i32 = arith.constant 0 : i32
    %c0_i32_0 = arith.constant 0 : i32
    return %arg0, %c0_i32 : i32, i32
  }
  func.func @transform_1(%arg0: i32) -> (i32, i32) {
    %c0_i32 = arith.constant 0 : i32
    %c0_i32_0 = arith.constant 0 : i32
    %c0_i32_1 = arith.constant 0 : i32
    return %c0_i32, %c0_i32_0 : i32, i32
  }
  func.func @transform_2(%arg0: i32) -> (i32, i32) {
    %c0_i32 = arith.constant 0 : i32
    %c0_i32_0 = arith.constant 0 : i32
    %c0_i32_1 = arith.constant 0 : i32
    return %c0_i32, %c0_i32_0 : i32, i32
  }
  func.func @transform_3(%arg0: i32) -> (i32, i32) {
    %c0_i32 = arith.constant 0 : i32
    %c0_i32_0 = arith.constant 0 : i32
    %c0_i32_1 = arith.constant 0 : i32
    return %c0_i32, %c0_i32_0 : i32, i32
  }
  func.func @transform_4(%arg0: i32) -> (i32, i32) {
    %c0_i32 = arith.constant 0 : i32
    %c0_i32_0 = arith.constant 0 : i32
    %c0_i32_1 = arith.constant 0 : i32
    return %c0_i32, %c0_i32_0 : i32, i32
  }
  func.func @transform_5(%arg0: i32) -> (i32, i32) {
    %c0_i32 = arith.constant 0 : i32
    %c0_i32_0 = arith.constant 0 : i32
    %c0_i32_1 = arith.constant 0 : i32
    return %c0_i32, %c0_i32_0 : i32, i32
  }
  func.func @transform_6(%arg0: i32) -> (i32, i32) {
    %c0_i32 = arith.constant 0 : i32
    %c0_i32_0 = arith.constant 0 : i32
    return %c0_i32, %arg0 : i32, i32
  }
}

</mosaic_0001>

<bundles_post_ra>
// kernel: tpu_custom_call.1
= control target key start
LH: loop header
LB: loop body
LE: loop exit
PB: predicated region body
PF: predicated region fallthrough
CT: control target
= control target key end

     0   :  { %11 = vsyncpa [#allocation3], 0  ;;  %s721_s0 = inlined_call_operand.hbm [shape: f32[16,60], index: 0, kind: input, shape index: {}]   ;;  %s722_s1 = inlined_call_operand.vmem [shape: bf16[61,60], index: 1, kind: input, shape index: {}]   ;;  %s723_s2 = inlined_call_operand.vmem [shape: f32[61,1], index: 2, kind: input, shape index: {}]   ;;  %s724_s3 = inlined_call_operand.vmem [shape: bf16[61,61], index: 3, kind: input, shape index: {}]   ;;  %s725_s4 = inlined_call_operand.hbm [shape: bf16[61,61], index: 4, kind: input, shape index: {}]   ;;  %s726_s5 = inlined_call_operand.vmem [shape: bf16[1,61], index: 5, kind: input, shape index: {}]   ;;  %s727_s6 = inlined_call_operand.hbm [shape: f32[1,16], index: 6, kind: output, shape index: {}]  }
   0x1   :  { %12 = vsyncpa [#allocation6], 0 }
   0x2   :  { %13 = vsyncpa [#allocation4], 0  ;;  %s18_s23 = sshll.u32 %s721_s0, 4  ;;  %s592_s24 = smov [#allocation2]   ;;  %s19_s23 = int_to_ptr.hbm [resolvable:$true] %s18_s23 }
   0x3   :  { %s20_s25 = sshll.u32 %s592_s24, 4  ;;  %s37_s28 = sshll.u32 %s725_s4, 4  ;;  %s21_s25 = int_to_ptr.vmem [resolvable:$true] %s20_s25  ;;  %s38_s28 = int_to_ptr.hbm [resolvable:$true] %s37_s28 }
   0x4   :  { %s593_s29 = smov 128   ;;  %s594_s30 = smov 8  }
   0x5   :  { %26 = dma.hbm_to_vmem [thread:$0]  %s19_s23, 256, %s21_s25, [#allocation3], %s593_s29, %s593_s29, %s594_s30  }
   0x6   :  { %s595_s7 = smov [#allocation5]   ;;  %s596_s9 = smov 64  }
   0x7   :  { %s39_s8 = sshll.u32 %s595_s7, 4  ;;  %s597_s10 = smov 4   ;;  %s40_s8 = int_to_ptr.vmem [resolvable:$true] %s39_s8 }
   0x8   :  { %45 = dma.hbm_to_vmem [thread:$0]  %s38_s28, 512, %s40_s8, [#allocation6], %s596_s9, %s596_s9, %s597_s10  }
   0x9   :  { %586 = dma.done.wait [#allocation3], 256  }
   0xa   :  { %587 = vsyncadd [#allocation3], 4294967040 }
   0xb   :  { %588 = dma.done.wait [#allocation6], 512  }
   0xc   :  { %589 = vsyncadd [#allocation6], 4294966784  ;;  %v598_v0 = vmov 0   ;;  %v57_v1 = vld [vmem:[#allocation2] sm:$0xff]  ;;  %v58_v2 = vld [vmem:[#allocation2 + $0x8] sm:$0xff]  ;;  %vm136_vm0 = vcmask 490496  }
   0xd   :  { %507 = vset.pattern.permute.xlu0 %v598_v0  ;;  %508 = vset.pattern.permute.xlu1 %v598_v0  ;;  %v74_v3 = vld [vmem:[%s723_s2 + $0x30] sm:$0xff]  ;;  %v59_v4 = vpack.c.bf16 %v58_v2, %v57_v1  ;;  %v72_v5 = vld [vmem:[%s723_s2 + $0x20] sm:$0xff]  ;;  %v75_v7 = vld [vmem:[%s723_s2 + $0x38] sm:$0x1f]  ;;  %vm234_vm1 = vcmask 1045504   ;;  %vm235_vm2 = vcmask 1046528  }
   0xe   :  { %509 = vset.pattern.permute.xlu2 %v598_v0  ;;  %108 = vperm.xlu0 %507, %v74_v3   ;;  %v486_v8 = vld [vmem:[%s722_s1] sm:$0xff]  ;;  %v73_v9 = vld [vmem:[%s723_s2 + $0x28] sm:$0xff]  ;;  %v70_v13 = vld [vmem:[%s723_s2 + $0x10] sm:$0xff]  ;;  %v599_v34 = vmov 65535   ;;  %vm221_vm3 = vcmask 498688   ;;  %s600_s18 = smov [#allocation7]  }
   0xf   :  { %98 = vperm.xlu1 %508, %v72_v5   ;;  %v150_v6 = vsel %vm136_vm0, %v59_v4, 0  ;;  %v68_v10 = vld [vmem:[%s723_s2] sm:$0xff]  ;;  %v69_v11 = vld [vmem:[%s723_s2 + $0x8] sm:$0xff]  ;;  %88 = vperm.xlu2 %509, %v70_v13   ;;  %v71_v14 = vld [vmem:[%s723_s2 + $0x18] sm:$0xff]  ;;  %v236_v35 = vsel %vm234_vm1, 4294967295, %v599_v34  ;;  %s412_s19 = sshll.u32 %s600_s18, 4  ;;  %s413_s19 = int_to_ptr.vmem [resolvable:$true] %s412_s19 }
  0x10   :  { %159 = vmatpush.bf16.xpose.msra.mxu0 %v150_v6  ;;  %v487_v12 = vld [vmem:[%s722_s1 + $0x8] sm:$0xff]  ;;  %v488_v15 = vld [vmem:[%s722_s1 + $0x10] sm:$0xff]  ;;  %v439_v16 = vld [vmem:[%s722_s1 + $0x18] sm:$0xf]  ;;  %v686_v40 = vsel %vm235_vm2, %v236_v35, 0  ;;  %s414_s21 = sshll.u32 %s727_s6, 4  ;;  %s415_s21 = int_to_ptr.hbm [resolvable:$true] %s414_s21 }
  0x11   :  { %v489_v17 = vld [vmem:[%s722_s1 + $0x18] sm:$0x70]  ;;  %v490_v59 = vld [vmem:[%s724_s3] sm:$0xff]  ;;  %v491_v60 = vld [vmem:[%s724_s3 + $0x8] sm:$0xff]  ;;  %vm405_vm7 = vcmask 122880  }
  0x12   :  { %v440_v18 = vor.u32 %v489_v17, %v439_v16  ;;  %v492_v61 = vld [vmem:[%s724_s3 + $0x10] sm:$0xff]  ;;  %v459_v62 = vld [vmem:[%s724_s3 + $0x18] sm:$0xf]  ;;  %v493_v63 = vld [vmem:[%s724_s3 + $0x18] sm:$0x70] }
  0x13   :  { %v460_v0 = vor.u32 %v493_v63, %v459_v62 }
  0x16   :  { %113 = vperm.xlu0 %507, %v75_v7  }
  0x17   :  { %103 = vperm.xlu1 %508, %v73_v9   ;;  %441 = vmatmul.msk.bf16.vlgmr.msra.gmra.mxu0 %vm136_vm0, %v486_v8 }
  0x18   :  { %93 = vperm.xlu2 %509, %v71_v14  }
  0x1e   :  { %78 = vperm.xlu0 %507, %v68_v10  }
  0x1f   :  { %83 = vperm.xlu1 %508, %v69_v11  }
  0x27   :  { %442 = vmatmul.msk.bf16.gmra.mxu0 %vm136_vm0, %v487_v12 }
  0x37   :  { %443 = vmatmul.msk.bf16.gmra.mxu0 %vm136_vm0, %v488_v15 }
  0x47   :  { %444 = vmatmul.msk.bf16.gmra.mxu0 %vm136_vm0, %v440_v18 }
  0x69   :  { %v89_v28 = vpop.permute.xlu2 %88 }
  0x72   :  { %v94_v39 = vpop.permute.xlu2 %93 }
  0x80   :  { %v109_v26 = vpop.permute.xlu0 %108 }
  0x81   :  { %v99_v25 = vpop.permute.xlu1 %98 }
  0x88   :  { %v114_v31 = vpop.permute.xlu0 %113 }
  0x89   :  { %v104_v29 = vpop.permute.xlu1 %103 }
  0x90   :  { %v79_v49 = vpop.permute.xlu0 %78 }
  0x91   :  { %v84_v46 = vpop.permute.xlu1 %83 }
  0x94   :  { %v161_v19 = vpop.f32.mrf.mxu0 }
  0x95   :  { %v162_v53 = vadd.f32 %v161_v19, %v79_v49 }
  0x97   :  { %v181_v57 = vmax.f32 %v162_v53, 0.0 }
  0x9c   :  { %v163_v20 = vpop.f32.mrf.mxu0 }
  0x9d   :  { %v164_v50 = vadd.f32 %v163_v20, %v84_v46 }
  0x9f   :  { %v182_v55 = vmax.f32 %v164_v50, 0.0  ;;  %v366_v50 = vld [vmem:[%s726_s5] sm:$0x1] }
  0xa1   :  { %v189_v58 = vpack.c.bf16 %v182_v55, %v181_v57 }
  0xa4   :  { %v166_v21 = vpop.f32.mrf.mxu0 }
  0xa5   :  { %v167_v47 = vadd.f32 %v166_v21, %v89_v28 }
  0xa7   :  { %v183_v54 = vmax.f32 %v167_v47, 0.0 }
  0xac   :  { %v168_v22 = vpop.f32.mrf.mxu0 }
  0xad   :  { %v169_v43 = vadd.f32 %v168_v22, %v94_v39  ;;  %v494_v22 = vld [vmem:[#allocation5] sm:$0xff] }
  0xaf   :  { %v184_v51 = vmax.f32 %v169_v43, 0.0 }
  0xb1   :  { %v190_v56 = vpack.c.bf16 %v184_v51, %v183_v54 }
  0xb4   :  { %v171_v23 = vpop.f32.mrf.mxu0 }
  0xb5   :  { %v172_v41 = vadd.f32 %v171_v23, %v99_v25  ;;  %v495_v23 = vld [vmem:[#allocation5 + $0x8] sm:$0xff]  ;;  %v479_v25 = vld [vmem:[#allocation5 + $0x18] sm:$0xf] }
  0xb7   :  { %v185_v48 = vmax.f32 %v172_v41, 0.0 }
  0xbc   :  { %v173_v24 = vpop.f32.mrf.mxu0 }
  0xbd   :  { %v174_v36 = vadd.f32 %v173_v24, %v104_v29  ;;  %v496_v24 = vld [vmem:[#allocation5 + $0x10] sm:$0xff] }
  0xbf   :  { %v186_v44 = vmax.f32 %v174_v36, 0.0 }
  0xc1   :  { %v191_v52 = vpack.c.bf16 %v186_v44, %v185_v48 }
  0xc4   :  { %v176_v27 = vpop.f32.mrf.mxu0 }
  0xc5   :  { %v177_v30 = vadd.f32 %v176_v27, %v109_v26  ;;  %v497_v26 = vld [vmem:[#allocation5 + $0x18] sm:$0x70] }
  0xc6   :  { %v480_v27 = vor.u32 %v497_v26, %v479_v25 }
  0xc7   :  { %v187_v37 = vmax.f32 %v177_v30, 0.0 }
  0xcc   :  { %v178_v32 = vpop.f32.mrf.mxu0 }
  0xcd   :  { %v179_v33 = vadd.f32 %v178_v32, %v114_v31 }
  0xcf   :  { %v188_v38 = vmax.f32 %v179_v33, 0.0 }
  0xd1   :  { %v192_v42 = vpack.c.bf16 %v188_v38, %v187_v37 }
  0xd3   :  { %v239_v45 = vand.u32 %v686_v40, %v192_v42 }
  0xd5   :  { %245 = vmatpush.bf16.msra.mxu1 %v239_v45 }
  0xd9   :  { %246 = vmatpush.bf16.msra.mxu1 %v191_v52 }
  0xdd   :  { %247 = vmatpush.bf16.msra.mxu1 %v190_v56 }
  0xe1   :  { %248 = vmatpush.bf16.msra.mxu1 %v189_v58 }
  0xe4   :  { %461 = vmatmul.msk.bf16.vlgmr.msra.gmra.mxu1 %vm221_vm3, %v490_v59 }
  0xf4   :  { %462 = vmatmul.msk.bf16.gmra.mxu1 %vm221_vm3, %v491_v60 }
 0x104   :  { %463 = vmatmul.msk.bf16.gmra.mxu1 %vm221_vm3, %v492_v61 }
 0x114   :  { %464 = vmatmul.msk.bf16.gmra.mxu1 %vm221_vm3, %v460_v0 }
 0x161   :  { %v250_v1 = vpop.f32.mrf.mxu1 }
 0x162   :  { %v270_v20 = vmax.f32 %v250_v1, 0.0 }
 0x169   :  { %v252_v2 = vpop.f32.mrf.mxu1 }
 0x16a   :  { %v271_v18 = vmax.f32 %v252_v2, 0.0 }
 0x16c   :  { %v278_v21 = vpack.c.bf16 %v271_v18, %v270_v20 }
 0x171   :  { %v255_v3 = vpop.f32.mrf.mxu1 }
 0x172   :  { %v272_v17 = vmax.f32 %v255_v3, 0.0 }
 0x179   :  { %v257_v4 = vpop.f32.mrf.mxu1 }
 0x17a   :  { %v273_v15 = vmax.f32 %v257_v4, 0.0 }
 0x17c   :  { %v279_v19 = vpack.c.bf16 %v273_v15, %v272_v17 }
 0x181   :  { %v260_v5 = vpop.f32.mrf.mxu1 }
 0x182   :  { %v274_v14 = vmax.f32 %v260_v5, 0.0 }
 0x189   :  { %v262_v6 = vpop.f32.mrf.mxu1 }
 0x18a   :  { %v275_v12 = vmax.f32 %v262_v6, 0.0 }
 0x18c   :  { %v280_v16 = vpack.c.bf16 %v275_v12, %v274_v14 }
 0x191   :  { %v265_v7 = vpop.f32.mrf.mxu1 }
 0x192   :  { %v276_v9 = vmax.f32 %v265_v7, 0.0 }
 0x199   :  { %v267_v8 = vpop.f32.mrf.mxu1 }
 0x19a   :  { %v277_v10 = vmax.f32 %v267_v8, 0.0 }
 0x19c   :  { %v281_v11 = vpack.c.bf16 %v277_v10, %v276_v9 }
 0x19e   :  { %v323_v13 = vand.u32 %v281_v11, %v686_v40 }
 0x1a0   :  { %329 = vmatpush.bf16.msra.mxu2 %v323_v13 }
 0x1a4   :  { %330 = vmatpush.bf16.msra.mxu2 %v280_v16 }
 0x1a8   :  { %331 = vmatpush.bf16.msra.mxu2 %v279_v19 }
 0x1ac   :  { %332 = vmatpush.bf16.msra.mxu2 %v278_v21 }
 0x1af   :  { %481 = vmatmul.msk.bf16.vlgmr.msra.gmra.mxu2 %vm221_vm3, %v494_v22 }
 0x1bf   :  { %482 = vmatmul.msk.bf16.gmra.mxu2 %vm221_vm3, %v495_v23 }
 0x1cf   :  { %483 = vmatmul.msk.bf16.gmra.mxu2 %vm221_vm3, %v496_v24 }
 0x1df   :  { %484 = vmatmul.msk.bf16.gmra.mxu2 %vm221_vm3, %v480_v27 }
 0x232   :  { %v334_v28 = vpop.f32.mrf.mxu2 }
 0x233   :  { %v354_v48 = vmax.f32 %v334_v28, 0.0 }
 0x23a   :  { %v336_v29 = vpop.f32.mrf.mxu2 }
 0x23b   :  { %v355_v46 = vmax.f32 %v336_v29, 0.0 }
 0x23d   :  { %v362_v49 = vpack.c.bf16 %v355_v46, %v354_v48 }
 0x242   :  { %v339_v30 = vpop.f32.mrf.mxu2 }
 0x243   :  { %v356_v45 = vmax.f32 %v339_v30, 0.0 }
 0x24a   :  { %v341_v31 = vpop.f32.mrf.mxu2 }
 0x24b   :  { %v357_v43 = vmax.f32 %v341_v31, 0.0 }
 0x24d   :  { %v363_v47 = vpack.c.bf16 %v357_v43, %v356_v45 }
 0x252   :  { %v344_v32 = vpop.f32.mrf.mxu2 }
 0x253   :  { %v358_v42 = vmax.f32 %v344_v32, 0.0 }
 0x25a   :  { %v346_v33 = vpop.f32.mrf.mxu2 }
 0x25b   :  { %v359_v39 = vmax.f32 %v346_v33, 0.0 }
 0x25d   :  { %v364_v44 = vpack.c.bf16 %v359_v39, %v358_v42 }
 0x262   :  { %v349_v34 = vpop.f32.mrf.mxu2 }
 0x263   :  { %v360_v36 = vmax.f32 %v349_v34, 0.0 }
 0x26a   :  { %v351_v35 = vpop.f32.mrf.mxu2 }
 0x26b   :  { %v361_v37 = vmax.f32 %v351_v35, 0.0 }
 0x26d   :  { %v365_v38 = vpack.c.bf16 %v361_v37, %v360_v36 }
 0x26f   :  { %v371_v41 = vand.u32 %v365_v38, %v686_v40 }
 0x271   :  { %377 = vmatpush.bf16.msra.mxu3 %v371_v41 }
 0x275   :  { %378 = vmatpush.bf16.msra.mxu3 %v364_v44 }
 0x279   :  { %379 = vmatpush.bf16.msra.mxu3 %v363_v47 }
 0x27d   :  { %380 = vmatpush.bf16.msra.mxu3 %v362_v49 }
 0x280   :  { %485 = vmatmul.msk.bf16.vlgmr.msra.gmra.mxu3 %vm221_vm3, %v366_v50 }
 0x303   :  { %v382_v51 = vpop.f32.mrf.mxu3 }
 0x304   :  { %v386_v40 = vsub.f32 0.0, %v382_v51 }
 0x306   :  { %v387_v52 = vmul.f32 1.442695, %v386_v40 }
 0x308   :  { %510 = vpow2.f32 %v387_v52 }
 0x30b   :  { %v384_v53 = vpop.f32.mrf.mxu3 }
 0x30e   :  { %v511_v54 = vpop.eup %510 }
 0x30f   :  { %v389_v55 = vadd.f32 1.0, %v511_v54 }
 0x311   :  { %512 = vrcp.f32 %v389_v55  ;;  %v401_v59 = vand.u32 2147483648, %v389_v55  ;;  %v399_v61 = vand.u32 2147483647, %v389_v55  ;;  %vm395_vm5 = vweird.f32 %v389_v55 }
 0x313   :  { %v402_v63 = vor.u32 1.1754944e-38, %v401_v59  ;;  %vm400_vm8 = vcmp.eq.f32.partialorder %v399_v61, 8.507059e+37 }
 0x317   :  { %v513_v56 = vpop.eup %512 }
 0x318   :  { %v391_v57 = vmul.f32 %v513_v56, %v389_v55  ;;  %vm396_vm4 = vweird.f32 %v513_v56 }
 0x319   :  { %vm397_vm6 = vmor %vm395_vm5, %vm396_vm4 }
 0x31a   :  { %v392_v58 = vsub.f32 1.0, %v391_v57 }
 0x31c   :  { %v393_v60 = vmul.f32 %v513_v56, %v392_v58 }
 0x31e   :  { %v394_v62 = vadd.f32 %v513_v56, %v393_v60 }
 0x320   :  { %v398_v0 = vsel %vm397_vm6, %v513_v56, %v394_v62 }
 0x321   :  { %v403_v1 = vsel %vm400_vm8, %v402_v63, %v398_v0 }
 0x322   :  { %406 = vst.msk [vmem:[#allocation7] sm:$0x1] %vm405_vm7, %v403_v1 }
 0x323   :  { %417 = dma.vmem_to_hbm [thread:$0]  %s413_s19, 16, %s415_s21, [#allocation4]  }
 0x324   :  { %590 = dma.done.wait [#allocation4], 16  }
 0x325   :  { %591 = vsyncadd [#allocation4], 4294967280 }
 0x326   :  { %422 = vsyncpa [#allocation3], 1 }
 0x327   :  { %423 = vsyncpa [#allocation6], 1 }
 0x328   :  { %424 = vsyncpa [#allocation4], 1 }

</bundles_post_ra>
